<compile_context>
chip_gen: v7x
topology: tpu7x:2x2x1
jax: 0.10.0
libtpu: 0.0.40
codegen_flags: <defaults>
</compile_context>

<pallas_src>
import math
import functools

import jax
import jax.numpy as jnp
from jax import lax
from jax.experimental import pallas as pl
from jax.experimental.pallas import tpu as pltpu


_RMS_EPS = 1e-6


# --------------------------------------------------------------------------------------
# helpers
# --------------------------------------------------------------------------------------
def _pick_tile(dim, cap, mult=8):
    """Largest divisor of `dim` that is <= cap, preferring multiples of `mult`."""
    if dim <= cap:
        return dim
    best = None
    for t in range(cap, 0, -1):
        if dim % t == 0:
            if t % mult == 0:
                return t
            if best is None:
                best = t
    return best if best is not None else dim


def _vmem_limit_bytes():
    # Per-generation VMEM budget: ~3/4 of physical VMEM, capped at 96 MiB.
    # (v5e/v6e: 128 MiB physical -> 96 MiB; v7x: 64 MiB physical -> 48 MiB.)
    try:
        cap = int(pltpu.get_tpu_info().vmem_capacity_bytes)
    except Exception:
        cap = 128 * 1024 * 1024
    return max(32 * 1024 * 1024, min((cap * 3) // 4, 96 * 1024 * 1024))


def _const_spec(shape, mode):
    """BlockSpec for a grid-invariant (weight / table) input."""
    nd = len(shape)
    index_map = lambda *_: (0,) * nd
    if mode is None:
        return pl.BlockSpec(shape, index_map)
    # Grid-invariant blocks don't need double buffering -> halve their resident VMEM.
    return pl.BlockSpec(shape, index_map, pipeline_mode=mode)


def _rope_tables(S, Dh):
    pos = jnp.arange(S, dtype=jnp.float32)[:, None]                      # (S, 1)
    inv_freq = 1.0 / (10000.0 ** (jnp.arange(0, Dh, 2, dtype=jnp.float32) / Dh))
    ang = pos * inv_freq[None, :]                                        # (S, Dh/2)
    cos = jnp.concatenate([jnp.cos(ang), jnp.cos(ang)], axis=-1)         # (S, Dh)
    sin = jnp.concatenate([jnp.sin(ang), jnp.sin(ang)], axis=-1)         # (S, Dh)
    return cos, sin


def _rmsnorm(x, w, eps):
    ms = jnp.mean(x * x, axis=-1, keepdims=True)
    return x * lax.rsqrt(ms + eps) * w


# --------------------------------------------------------------------------------------
# kernel 1: RMSNorm(in) + fused QKV projection
# --------------------------------------------------------------------------------------
def _norm_qkv_kernel(x_ref, w_ref, wqkv_ref, qkv_ref, *, eps):
    x = x_ref[0].astype(jnp.float32)                                     # (ts, E), f32
    xn = _rmsnorm(x, w_ref[0], eps)
    qkv_ref[0] = jnp.dot(xn.astype(jnp.bfloat16), wqkv_ref[...],
                         preferred_element_type=jnp.float32).astype(qkv_ref.dtype)


# --------------------------------------------------------------------------------------
# kernel 2: RoPE + causal flash attention, all heads batched in one einsum
# --------------------------------------------------------------------------------------
def _rope(t, cos, sinf, half):
    # rotate-half RoPE with a sign-folded sin table:
    #   rope(t) = t*cos + roll(t, half)*sinf, where sinf = [-sin, +sin]
    rot = jnp.concatenate([t[..., half:], t[..., :half]], axis=-1)
    return t * cos + rot * sinf


def _flash_attn_kernel(cosq_ref, sinq_ref, cosk_ref, sink_ref,
                       q_ref, k_ref, v_ref, ctx_ref,
                       m_sc, l_sc, acc_sc, *, tq, tk, half):
    qi = pl.program_id(1)
    ki = pl.program_id(2)

    @pl.when(ki == 0)
    def _():
        m_sc[...] = jnp.full(m_sc.shape, -jnp.inf, dtype=m_sc.dtype)
        l_sc[...] = jnp.zeros(l_sc.shape, dtype=l_sc.dtype)
        acc_sc[...] = jnp.zeros(acc_sc.shape, dtype=acc_sc.dtype)

    # Skip KV tiles that lie entirely above the causal diagonal.
    @pl.when(ki * tk < (qi + 1) * tq)
    def _():
        # q/k blocks are (H, tq/tk, Dh) bf16; RoPE in f32 (1/sqrt(Dh) folded into q tables).
        qh = _rope(q_ref[0].astype(jnp.float32),
                   cosq_ref[...][None], sinq_ref[...][None], half)
        kh = _rope(k_ref[0].astype(jnp.float32),
                   cosk_ref[...][None], sink_ref[...][None], half)

        s = jnp.einsum('hqd,hkd->hqk',
                       qh.astype(jnp.bfloat16), kh.astype(jnp.bfloat16),
                       preferred_element_type=jnp.float32)               # (H, tq, tk)

        # Causal mask (only the diagonal tiles truly need it; the select is cheap VPU
        # work hidden under the MXU, fully-masked tiles never reach this point).
        row = qi * tq + lax.broadcasted_iota(jnp.int32, (tq, tk), 0)
        col = ki * tk + lax.broadcasted_iota(jnp.int32, (tq, tk), 1)
        s = jnp.where((col <= row)[None], s, -1e30)

        m_prev = m_sc[...]
        m_new = jnp.maximum(m_prev, jnp.max(s, axis=-1, keepdims=True))
        alpha = jnp.exp(m_prev - m_new)
        p = jnp.exp(s - m_new)
        l_sc[...] = alpha * l_sc[...] + jnp.sum(p, axis=-1, keepdims=True)
        acc_sc[...] = alpha * acc_sc[...] + jnp.einsum(
            'hqk,hkd->hqd', p.astype(jnp.bfloat16), v_ref[0],
            preferred_element_type=jnp.float32)
        m_sc[...] = m_new

    @pl.when(ki == pl.num_programs(2) - 1)
    def _():
        ctx_ref[0] = (acc_sc[...] *
                      pl.reciprocal(l_sc[...], approx=True)).astype(ctx_ref.dtype)


# --------------------------------------------------------------------------------------
# kernel 3: Wo projection + residual + RMSNorm(out) + F-tiled SwiGLU FFN + residual
# --------------------------------------------------------------------------------------
def _oproj_ffn_kernel(x_ref, ctx_ref, wo_ref, w2_ref, wgu_ref, wd_ref, y_ref,
                      xskip_sc, xn2_sc, acc_sc, *, eps, tf):
    fi = pl.program_id(2)

    @pl.when(fi == 0)
    def _():
        attn = jnp.dot(ctx_ref[0], wo_ref[...],
                       preferred_element_type=jnp.float32)               # (ts, E)
        xs = x_ref[0].astype(jnp.float32) + attn                         # residual 1 (f32)
        xskip_sc[...] = xs
        xn2_sc[...] = _rmsnorm(xs, w2_ref[0], eps).astype(jnp.bfloat16)
        acc_sc[...] = jnp.zeros(acc_sc.shape, dtype=acc_sc.dtype)

    # One F-tile of the SwiGLU FFN: fused (gate|up) matmul, SiLU gate (f32),
    # down-projection accumulated across F tiles.
    gu = jnp.dot(xn2_sc[...], wgu_ref[0],
                 preferred_element_type=jnp.float32)                     # (ts, 2*tf)
    g = gu[:, :tf]
    u = gu[:, tf:]
    h = (g * lax.logistic(g)) * u                                        # SiLU(g) * u
    acc_sc[...] += jnp.dot(h.astype(jnp.bfloat16), wd_ref[...],
                           preferred_element_type=jnp.float32)

    @pl.when(fi == pl.num_programs(2) - 1)
    def _():
        y_ref[0] = (xskip_sc[...] + acc_sc[...]).astype(y_ref.dtype)     # residual 2


# --------------------------------------------------------------------------------------
# wrapper
# --------------------------------------------------------------------------------------
def _forward(x_emb, params, *, head_num, const_mode, eps=_RMS_EPS):
    B, S, E = x_emb.shape
    P = params["wq"].shape[1]
    F = params["wg"].shape[1]
    assert P % head_num == 0, "proj_dim must be divisible by head_num"
    Dh = P // head_num
    assert Dh % 2 == 0, "head_dim must be even for rotate-half RoPE"

    ts = _pick_tile(S, 256)    # sequence tile for projection / FFN kernels
    tq = _pick_tile(S, 128)    # query tile
    tk = _pick_tile(S, 128)    # key/value tile
    tf = _pick_tile(F, 512)    # FFN hidden tile
    n_f = F // tf

    bf16, f32 = jnp.bfloat16, jnp.float32

    # ---- weight packing: bf16 MXU inputs, fused QKV and per-F-tile fused gate|up ----
    w_qkv = jnp.concatenate(
        [params["wq"], params["wk"], params["wv"]], axis=1).astype(bf16)     # (E, 3P)
    wo = params["wo"].astype(bf16)                                           # (P, E)
    wg_t = params["wg"].reshape(E, n_f, tf).transpose(1, 0, 2)
    wu_t = params["wu"].reshape(E, n_f, tf).transpose(1, 0, 2)
    w_gu = jnp.concatenate([wg_t, wu_t], axis=-1).astype(bf16)               # (n_f, E, 2*tf)
    wd = params["wd"].astype(bf16)                                           # (F, E)
    rms_in_w = params["rms_in_w"].reshape(1, E).astype(f32)
    rms_out_w = params["rms_out_w"].reshape(1, E).astype(f32)

    # ---- RoPE tables: sign-folded sin, 1/sqrt(Dh) folded into the q tables ----
    cos, sin = _rope_tables(S, Dh)
    sinf = jnp.concatenate([-sin[:, :Dh // 2], sin[:, Dh // 2:]], axis=-1)
    scale = 1.0 / math.sqrt(Dh)
    cos_q, sin_q = (cos * scale).astype(f32), (sinf * scale).astype(f32)
    cos_k, sin_k = cos.astype(f32), sinf.astype(f32)

    vmem = _vmem_limit_bytes()

    # ================= kernel 1: RMSNorm(in) + fused QKV =================
    qkv = pl.pallas_call(
        functools.partial(_norm_qkv_kernel, eps=eps),
        out_shape=jax.ShapeDtypeStruct((B, S, 3 * P), bf16),
        grid_spec=pltpu.PrefetchScalarGridSpec(
            num_scalar_prefetch=0,
            grid=(B, S // ts),
            in_specs=[
                pl.BlockSpec((1, ts, E), lambda b, i: (b, i, 0)),
                _const_spec((1, E), const_mode),
                _const_spec((E, 3 * P), const_mode),
            ],
            out_specs=pl.BlockSpec((1, ts, 3 * P), lambda b, i: (b, i, 0)),
        ),
        compiler_params=pltpu.CompilerParams(
            dimension_semantics=("parallel", "parallel"),
            vmem_limit_bytes=vmem),
    )(x_emb, rms_in_w, w_qkv)

    # Layout glue (plain XLA): split fused QKV, heads to a leading axis -> (B, H, S, Dh).
    qkv = qkv.reshape(B, S, 3, head_num, Dh)
    q = jnp.transpose(qkv[:, :, 0], (0, 2, 1, 3))
    k = jnp.transpose(qkv[:, :, 1], (0, 2, 1, 3))
    v = jnp.transpose(qkv[:, :, 2], (0, 2, 1, 3))

    # ================= kernel 2: RoPE + causal flash attention =================
    ctx = pl.pallas_call(
        functools.partial(_flash_attn_kernel, tq=tq, tk=tk, half=Dh // 2),
        out_shape=jax.ShapeDtypeStruct((B, head_num, S, Dh), bf16),
        grid_spec=pltpu.PrefetchScalarGridSpec(
            num_scalar_prefetch=0,
            grid=(B, S // tq, S // tk),
            in_specs=[
                pl.BlockSpec((tq, Dh), lambda b, qi, ki: (qi, 0)),   # cos (q rows, scaled)
                pl.BlockSpec((tq, Dh), lambda b, qi, ki: (qi, 0)),   # sin (q rows, scaled)
                pl.BlockSpec((tk, Dh), lambda b, qi, ki: (ki, 0)),   # cos (k rows)
                pl.BlockSpec((tk, Dh), lambda b, qi, ki: (ki, 0)),   # sin (k rows)
                pl.BlockSpec((1, head_num, tq, Dh), lambda b, qi, ki: (b, 0, qi, 0)),
                pl.BlockSpec((1, head_num, tk, Dh), lambda b, qi, ki: (b, 0, ki, 0)),
                pl.BlockSpec((1, head_num, tk, Dh), lambda b, qi, ki: (b, 0, ki, 0)),
            ],
            out_specs=pl.BlockSpec((1, head_num, tq, Dh),
                                   lambda b, qi, ki: (b, 0, qi, 0)),
            scratch_shapes=[
                pltpu.VMEM((head_num, tq, 1), f32),     # running max
                pltpu.VMEM((head_num, tq, 1), f32),     # running sum
                pltpu.VMEM((head_num, tq, Dh), f32),    # output accumulator
            ],
        ),
        compiler_params=pltpu.CompilerParams(
            dimension_semantics=("parallel", "parallel", "arbitrary"),
            vmem_limit_bytes=vmem),
    )(cos_q, sin_q, cos_k, sin_k, q, k, v)

    # Layout glue (plain XLA): (B, H, S, Dh) -> lane-dense (B, S, P) for the out-projection.
    attn_ctx = jnp.transpose(ctx, (0, 2, 1, 3)).reshape(B, S, P)

    # ======= kernel 3: Wo + residual + RMSNorm(out) + F-tiled SwiGLU + residual =======
    y = pl.pallas_call(
        functools.partial(_oproj_ffn_kernel, eps=eps, tf=tf),
        out_shape=jax.ShapeDtypeStruct((B, S, E), x_emb.dtype),
        grid_spec=pltpu.PrefetchScalarGridSpec(
            num_scalar_prefetch=0,
            grid=(B, S // ts, n_f),
            in_specs=[
                pl.BlockSpec((1, ts, E), lambda b, i, fi: (b, i, 0)),      # x (residual)
                pl.BlockSpec((1, ts, P), lambda b, i, fi: (b, i, 0)),      # attn context
                _const_spec((P, E), const_mode),                           # wo
                _const_spec((1, E), const_mode),                           # rms_out weight
                pl.BlockSpec((1, E, 2 * tf), lambda b, i, fi: (fi, 0, 0)),  # gate|up F-tile
                pl.BlockSpec((tf, E), lambda b, i, fi: (fi, 0)),            # down-proj F-tile
            ],
            out_specs=pl.BlockSpec((1, ts, E), lambda b, i, fi: (b, i, 0)),
            scratch_shapes=[
                pltpu.VMEM((ts, E), f32),     # x_skip residual stream
                pltpu.VMEM((ts, E), bf16),    # RMSNorm(out) activations
                pltpu.VMEM((ts, E), f32),     # FFN down-projection accumulator
            ],
        ),
        compiler_params=pltpu.CompilerParams(
            dimension_semantics=("parallel", "parallel", "arbitrary"),
            vmem_limit_bytes=vmem),
    )(x_emb, attn_ctx, wo, rms_out_w, w_gu, wd)

    return y


def modern_transformer_block(x_emb, params, *, head_num, eps=_RMS_EPS):
    """RMSNorm -> MHA (RoPE + causal flash attn) -> +res -> RMSNorm -> SwiGLU FF -> +res."""
    try:
        # Single-buffer the grid-invariant weights (halves their resident VMEM).
        out = _forward(x_emb, params, head_num=head_num, eps=eps,
                       const_mode=pl.Buffered(1))
        return jax.block_until_ready(out)
    except Exception:
        # TODO(synk): pipeline_mode=pl.Buffered(1) unsupported on this jax build;
        # fall back to default double-buffered weight blocks.
        out = _forward(x_emb, params, head_num=head_num, eps=eps, const_mode=None)
        return jax.block_until_ready(out)


# --------------------------------------------------------------------------------------
# pure-JAX reference (f32) and param init
# --------------------------------------------------------------------------------------
def _reference(x, params, head_num, eps=_RMS_EPS):
    B, S, E = x.shape
    P = params["wq"].shape[1]
    Dh = P // head_num
    rms = lambda v, w: v * lax.rsqrt(jnp.mean(v * v, -1, keepdims=True) + eps) * w
    xn = rms(x, params["rms_in_w"])
    q = (xn @ params["wq"]).reshape(B, S, head_num, Dh)
    k = (xn @ params["wk"]).reshape(B, S, head_num, Dh)
    v = (xn @ params["wv"]).reshape(B, S, head_num, Dh)
    cos, sin = _rope_tables(S, Dh)

    def rope(t):
        t1, t2 = t[..., :Dh // 2], t[..., Dh // 2:]
        rot = jnp.concatenate([-t2, t1], axis=-1)
        return t * cos[None, :, None, :] + rot * sin[None, :, None, :]

    q, k = rope(q), rope(k)
    s = jnp.einsum('bqhd,bkhd->bhqk', q, k) / math.sqrt(Dh)
    causal = jnp.tril(jnp.ones((S, S), bool))
    s = jnp.where(causal[None, None], s, -1e30)
    p = jax.nn.softmax(s, axis=-1)
    ctx = jnp.einsum('bhqk,bkhd->bqhd', p, v).reshape(B, S, P)
    x_skip = x + ctx @ params["wo"]
    xn2 = rms(x_skip, params["rms_out_w"])
    g = xn2 @ params["wg"]
    u = xn2 @ params["wu"]
    return x_skip + (jax.nn.silu(g) * u) @ params["wd"]


def init_params(key, emb_dim, proj_dim, ff_dim):
    ks = jax.random.split(key, 7)
    std = 0.02
    return {
        "rms_in_w":  jnp.ones((emb_dim,), jnp.float32),
        "rms_out_w": jnp.ones((emb_dim,), jnp.float32),
        "wq": std * jax.random.normal(ks[0], (emb_dim, proj_dim), jnp.float32),
        "wk": std * jax.random.normal(ks[1], (emb_dim, proj_dim), jnp.float32),
        "wv": std * jax.random.normal(ks[2], (emb_dim, proj_dim), jnp.float32),
        "wo": std * jax.random.normal(ks[3], (proj_dim, emb_dim), jnp.float32),
        "wg": std * jax.random.normal(ks[4], (emb_dim, ff_dim), jnp.float32),
        "wu": std * jax.random.normal(ks[5], (emb_dim, ff_dim), jnp.float32),
        "wd": std * jax.random.normal(ks[6], (ff_dim, emb_dim), jnp.float32),
    }


if __name__ == "__main__":
    # Small shapes consistent with the module's forward: (batch, seq, emb_dim)
    B, S, E = 2, 8, 32
    head_num, proj_dim, ff_dim = 2, 32, 64   # head_dim = 16

    key = jax.random.PRNGKey(0)
    k_x, k_p = jax.random.split(key)
    x_emb = jax.random.normal(k_x, (B, S, E), jnp.float32)
    params = init_params(k_p, E, proj_dim, ff_dim)

    out = modern_transformer_block(x_emb, params, head_num=head_num)
    out = jax.block_until_ready(out)
    assert out.shape == (B, S, E) and out.dtype == jnp.float32
    assert bool(jnp.all(jnp.isfinite(out)))

    # Loose tolerance: kernel runs matmuls in bf16 (f32 accumulation), reference is pure f32.
    ref = _reference(x_emb, params, head_num)
    assert bool(jnp.allclose(out, ref, rtol=5e-2, atol=5e-2)), float(
        jnp.max(jnp.abs(out - ref)))

    print("KERNEL_OK")
</pallas_src>

<mosaic_0001>
module attributes {stable_mosaic.version = 11 : i64} {
  func.func @_norm_qkv_kernel(%arg0: i32, %arg1: i32, %arg2: memref<1x8x32xf32, #tpu.memory_space<vmem>>, %arg3: memref<1x32xf32, #tpu.memory_space<vmem>>, %arg4: memref<32x96xbf16, #tpu.memory_space<vmem>>, %arg5: memref<1x8x96xbf16, #tpu.memory_space<vmem>>) attributes {dimension_semantics = [#tpu.dimension_semantics<parallel>, #tpu.dimension_semantics<parallel>], iteration_bounds = array<i64: 2, 1>, scalar_prefetch = 0 : i64, scratch_operands = 0 : i64, tpu.core_type = #tpu.core_type<tc>, window_params = [{transform_indices = @transform_0, window_bounds = array<i64: 1, 8, 32>}, {pipeline_mode = #tpu.pipeline_mode<synchronous>, transform_indices = @transform_1, window_bounds = array<i64: 1, 32>}, {pipeline_mode = #tpu.pipeline_mode<synchronous>, transform_indices = @transform_2, window_bounds = array<i64: 32, 96>}, {transform_indices = @transform_3, window_bounds = array<i64: 1, 8, 96>}]} {
    %c0 = arith.constant 0 : index
    %c0_0 = arith.constant 0 : index
    %c0_1 = arith.constant 0 : index
    %0 = vector.load %arg2[%c0, %c0_0, %c0_1] : memref<1x8x32xf32, #tpu.memory_space<vmem>>, vector<1x8x32xf32>
    %1 = vector.shape_cast %0 : vector<1x8x32xf32> to vector<8x32xf32>
    %c0_2 = arith.constant 0 : index
    %c0_3 = arith.constant 0 : index
    %2 = vector.load %arg3[%c0_2, %c0_3] : memref<1x32xf32, #tpu.memory_space<vmem>>, vector<1x32xf32>
    %3 = vector.shape_cast %2 : vector<1x32xf32> to vector<32xf32>
    %4 = arith.mulf %1, %1 : vector<8x32xf32>
    %cst = arith.constant dense<0.000000e+00> : vector<8xf32>
    %5 = vector.multi_reduction <add>, %4, %cst [1] : vector<8x32xf32> to vector<8xf32>
    %6 = vector.shape_cast %5 : vector<8xf32> to vector<8x1xf32>
    %cst_4 = arith.constant 3.200000e+01 : f32
    %7 = vector.broadcast %cst_4 : f32 to vector<8x1xf32>
    %8 = arith.divf %6, %7 : vector<8x1xf32>
    %cst_5 = arith.constant 9.99999997E-7 : f32
    %9 = vector.broadcast %cst_5 : f32 to vector<8x1xf32>
    %10 = arith.addf %8, %9 : vector<8x1xf32>
    %11 = math.rsqrt %10 : vector<8x1xf32>
    %12 = vector.broadcast %11 : vector<8x1xf32> to vector<8x32xf32>
    %13 = arith.mulf %1, %12 : vector<8x32xf32>
    %14 = vector.shape_cast %3 : vector<32xf32> to vector<1x32xf32>
    %15 = vector.broadcast %14 : vector<1x32xf32> to vector<8x32xf32>
    %16 = arith.mulf %13, %15 : vector<8x32xf32>
    %17 = arith.truncf %16 : vector<8x32xf32> to vector<8x32xbf16>
    %c0_6 = arith.constant 0 : index
    %c0_7 = arith.constant 0 : index
    %18 = vector.load %arg4[%c0_6, %c0_7] : memref<32x96xbf16, #tpu.memory_space<vmem>>, vector<32x96xbf16>
    %cst_8 = arith.constant dense<0.000000e+00> : vector<8x96xf32>
    %19 = tpu.matmul %17, %18, %cst_8 {dimension_numbers = #tpu.dot_dimension_numbers<[1], [0], [0], [1], [0, 0, 1, 1], [], []>} : vector<8x32xbf16>, vector<32x96xbf16>, vector<8x96xf32> -> vector<8x96xf32>
    %20 = arith.truncf %19 : vector<8x96xf32> to vector<8x96xbf16>
    %c0_9 = arith.constant 0 : index
    %c0_10 = arith.constant 0 : index
    %c0_11 = arith.constant 0 : index
    %21 = vector.load %arg5[%c0_9, %c0_10, %c0_11] : memref<1x8x96xbf16, #tpu.memory_space<vmem>>, vector<1x8x96xbf16>
    %22 = vector.shape_cast %21 : vector<1x8x96xbf16> to vector<8x96xbf16>
    %23 = vector.shape_cast %20 : vector<8x96xbf16> to vector<1x8x96xbf16>
    tpu.vector_store %arg5[%c0_9, %c0_10, %c0_11], %23 {strides = array<i32>} : memref<1x8x96xbf16, #tpu.memory_space<vmem>>, vector<1x8x96xbf16>,
    return
  }
  func.func @transform_0(%arg0: i32, %arg1: i32) -> (i32, i32, i32) {
    %c0_i32 = arith.constant 0 : i32
    %c0_i32_0 = arith.constant 0 : i32
    return %arg0, %arg1, %c0_i32 : i32, i32, i32
  }
  func.func @transform_1(%arg0: i32, %arg1: i32) -> (i32, i32) {
    %c0_i32 = arith.constant 0 : i32
    %c0_i32_0 = arith.constant 0 : i32
    %c0_i32_1 = arith.constant 0 : i32
    return %c0_i32, %c0_i32_0 : i32, i32
  }
  func.func @transform_2(%arg0: i32, %arg1: i32) -> (i32, i32) {
    %c0_i32 = arith.constant 0 : i32
    %c0_i32_0 = arith.constant 0 : i32
    %c0_i32_1 = arith.constant 0 : i32
    return %c0_i32, %c0_i32_0 : i32, i32
  }
  func.func @transform_3(%arg0: i32, %arg1: i32) -> (i32, i32, i32) {
    %c0_i32 = arith.constant 0 : i32
    %c0_i32_0 = arith.constant 0 : i32
    return %arg0, %arg1, %c0_i32 : i32, i32, i32
  }
}

module attributes {stable_mosaic.version = 11 : i64} {
  func.func @_norm_qkv_kernel(%arg0: i32, %arg1: i32, %arg2: memref<1x8x32xf32, #tpu.memory_space<vmem>>, %arg3: memref<1x32xf32, #tpu.memory_space<vmem>>, %arg4: memref<32x96xbf16, #tpu.memory_space<vmem>>, %arg5: memref<1x8x96xbf16, #tpu.memory_space<vmem>>) attributes {dimension_semantics = [#tpu.dimension_semantics<parallel>, #tpu.dimension_semantics<parallel>], iteration_bounds = array<i64: 2, 1>, scalar_prefetch = 0 : i64, scratch_operands = 0 : i64, tpu.core_type = #tpu.core_type<tc>, window_params = [{transform_indices = @transform_0, window_bounds = array<i64: 1, 8, 32>}, {pipeline_mode = #tpu.pipeline_mode<synchronous>, transform_indices = @transform_1, window_bounds = array<i64: 1, 32>}, {pipeline_mode = #tpu.pipeline_mode<synchronous>, transform_indices = @transform_2, window_bounds = array<i64: 32, 96>}, {transform_indices = @transform_3, window_bounds = array<i64: 1, 8, 96>}]} {
    %c0 = arith.constant 0 : index
    %c0_0 = arith.constant 0 : index
    %c0_1 = arith.constant 0 : index
    %0 = vector.load %arg2[%c0, %c0_0, %c0_1] : memref<1x8x32xf32, #tpu.memory_space<vmem>>, vector<1x8x32xf32>
    %1 = vector.shape_cast %0 : vector<1x8x32xf32> to vector<8x32xf32>
    %c0_2 = arith.constant 0 : index
    %c0_3 = arith.constant 0 : index
    %2 = vector.load %arg3[%c0_2, %c0_3] : memref<1x32xf32, #tpu.memory_space<vmem>>, vector<1x32xf32>
    %3 = vector.shape_cast %2 : vector<1x32xf32> to vector<32xf32>
    %4 = arith.mulf %1, %1 : vector<8x32xf32>
    %cst = arith.constant dense<0.000000e+00> : vector<8xf32>
    %5 = vector.multi_reduction <add>, %4, %cst [1] : vector<8x32xf32> to vector<8xf32>
    %6 = vector.shape_cast %5 : vector<8xf32> to vector<8x1xf32>
    %cst_4 = arith.constant 3.200000e+01 : f32
    %7 = vector.broadcast %cst_4 : f32 to vector<8x1xf32>
    %8 = arith.divf %6, %7 : vector<8x1xf32>
    %cst_5 = arith.constant 9.99999997E-7 : f32
    %9 = vector.broadcast %cst_5 : f32 to vector<8x1xf32>
    %10 = arith.addf %8, %9 : vector<8x1xf32>
    %11 = math.rsqrt %10 : vector<8x1xf32>
    %12 = vector.broadcast %11 : vector<8x1xf32> to vector<8x32xf32>
    %13 = arith.mulf %1, %12 : vector<8x32xf32>
    %14 = vector.shape_cast %3 : vector<32xf32> to vector<1x32xf32>
    %15 = vector.broadcast %14 : vector<1x32xf32> to vector<8x32xf32>
    %16 = arith.mulf %13, %15 : vector<8x32xf32>
    %17 = arith.truncf %16 : vector<8x32xf32> to vector<8x32xbf16>
    %c0_6 = arith.constant 0 : index
    %c0_7 = arith.constant 0 : index
    %18 = vector.load %arg4[%c0_6, %c0_7] : memref<32x96xbf16, #tpu.memory_space<vmem>>, vector<32x96xbf16>
    %cst_8 = arith.constant dense<0.000000e+00> : vector<8x96xf32>
    %19 = tpu.matmul %17, %18, %cst_8 {dimension_numbers = #tpu.dot_dimension_numbers<[1], [0], [0], [1], [0, 0, 1, 1], [], []>} : vector<8x32xbf16>, vector<32x96xbf16>, vector<8x96xf32> -> vector<8x96xf32>
    %20 = arith.truncf %19 : vector<8x96xf32> to vector<8x96xbf16>
    %c0_9 = arith.constant 0 : index
    %c0_10 = arith.constant 0 : index
    %c0_11 = arith.constant 0 : index
    %21 = vector.load %arg5[%c0_9, %c0_10, %c0_11] : memref<1x8x96xbf16, #tpu.memory_space<vmem>>, vector<1x8x96xbf16>
    %22 = vector.shape_cast %21 : vector<1x8x96xbf16> to vector<8x96xbf16>
    %23 = vector.shape_cast %20 : vector<8x96xbf16> to vector<1x8x96xbf16>
    tpu.vector_store %arg5[%c0_9, %c0_10, %c0_11], %23 {strides = array<i32>} : memref<1x8x96xbf16, #tpu.memory_space<vmem>>, vector<1x8x96xbf16>,
    return
  }
  func.func @transform_0(%arg0: i32, %arg1: i32) -> (i32, i32, i32) {
    %c0_i32 = arith.constant 0 : i32
    %c0_i32_0 = arith.constant 0 : i32
    return %arg0, %arg1, %c0_i32 : i32, i32, i32
  }
  func.func @transform_1(%arg0: i32, %arg1: i32) -> (i32, i32) {
    %c0_i32 = arith.constant 0 : i32
    %c0_i32_0 = arith.constant 0 : i32
    %c0_i32_1 = arith.constant 0 : i32
    return %c0_i32, %c0_i32_0 : i32, i32
  }
  func.func @transform_2(%arg0: i32, %arg1: i32) -> (i32, i32) {
    %c0_i32 = arith.constant 0 : i32
    %c0_i32_0 = arith.constant 0 : i32
    %c0_i32_1 = arith.constant 0 : i32
    return %c0_i32, %c0_i32_0 : i32, i32
  }
  func.func @transform_3(%arg0: i32, %arg1: i32) -> (i32, i32, i32) {
    %c0_i32 = arith.constant 0 : i32
    %c0_i32_0 = arith.constant 0 : i32
    return %arg0, %arg1, %c0_i32 : i32, i32, i32
  }
}

</mosaic_0001>

<bundles_post_ra>
// kernel: tpu_custom_call.1
= control target key start
LH: loop header
LB: loop body
LE: loop exit
PB: predicated region body
PF: predicated region fallthrough
CT: control target
= control target key end

     0   :  { %8 = vsyncpa [#allocation3], 0  ;;  %s998_s0 = inlined_call_operand.hbm [shape: f32[2,8,32], index: 0, kind: input, shape index: {}]   ;;  %s999_s1 = inlined_call_operand.hbm [shape: f32[1,32], index: 1, kind: input, shape index: {}]   ;;  %s1000_s2 = inlined_call_operand.hbm [shape: bf16[32,96], index: 2, kind: input, shape index: {}]   ;;  %s1001_s3 = inlined_call_operand.hbm [shape: bf16[2,8,96], index: 3, kind: output, shape index: {}]  }
   0x1   :  { %10 = vsyncpa [#allocation3 + $0x1], 0 }
   0x2   :  { %11 = vsyncpa [#allocation6], 0 }
   0x3   :  { %12 = vsyncpa [#allocation4], 0 }
   0x4   :  { %14 = vsyncpa [#allocation4 + $0x1], 0  ;;  %s752_s12 = smov 0   ;;  %s754_s13 = smov 0  }
   0x5   :  { %s756_s14 = smov 0   ;;  %s758_s15 = smov 0  }
   0x6   :  { %s760_s16 = smov 0   ;;  %s762_s17 = smov 0  }
   0x7 LB: > { %s427_s18 = sadd.s32 4294967295, %s722_s17   ;;  %s428_s19 = sadd.s32 4294967294, %s722_s17   ;;  %s722_s17 = sphi %s762_s17, %s20_s17   ;;  %s718_s16 = sphi %s760_s16, %s1024_s16   ;;  %s714_s15 = sphi %s758_s15, %s1023_s15   ;;  %s710_s14 = sphi %s756_s14, %s1022_s14   ;;  %s706_s13 = sphi %s754_s13, %s1021_s13   ;;  %s702_s12 = sphi %s752_s12, %s1020_s12  }
   0x8   : > { %p54_p0 = scmp.ne.s32.totalorder %s706_s13, %s702_s12  ;;  %p786_p1 = scmp.eq.s32.totalorder %s427_s18, 0 }
   0x9   : > { %p790_p2 = scmp.eq.s32.totalorder %s427_s18, 1  ;;  %p128_p3 = scmp.eq.s32.totalorder %s428_s19, 1 }
   0xa   : > { %s1006_s20 = scalar_select %p786_p1, 1, 0 }
   0xb   : > { %s1007_s21 = scalar_select %p790_p2, 1, 0 }
   0xc   : > { %p796_p4 = por %p786_p1, %p54_p0  ;;  %p429_p5 = scmp.ge.s32.totalorder %s722_s17, 1 }
   0xd   : > { %p801_p6 = por %p128_p3, %p54_p0  ;;  %p135_p7 = scmp.lt.s32.totalorder %s722_s17, 3 }
   0xe   : > { %s1008_s22 = scalar_select %p796_p4, 1, 0 }
   0xf   : > { %s1009_s23 = scalar_select %p801_p6, 1, 0 }
  0x10   : > { %p806_p8 = pnand %p429_p5, %p135_p7  ;;  %s724_s25 = smov [#allocation5]  }
  0x11   : > { %s148_s26 = sshll.u32 %s724_s25, 4  ;;  %s725_s27 = smov [#allocation7]   ;;  %s149_s26 = int_to_ptr.vmem [resolvable:$true] %s148_s26 }
  0x12   : > { %s1010_s24 = scalar_select %p806_p8, 1, 0 }
  0x13   : > { %p471_p10 = pneg %p806_p8  ;;  %s158_s28 = sshll.u32 %s725_s27, 4  ;;  %s819_s28 = int_to_ptr.vmem [resolvable:$true] %s158_s28 }
  0x14   : > { %s550_s5 = scalar_lea.hbm %s999_s1, 16 }
  0x15   : > { %p815_p11 = pnand %p471_p10, %p786_p1  ;;  %p551_p12 = scmp.ne.s32.totalorder %s999_s1, %s550_s5 }
  0x16   : > { %p557_p5 = scmp.lt.u32.totalorder %s550_s5, %s999_s1 }
  0x17   : > { %p552_p13 = pneg %p815_p11 }
  0x19   : > { %p553_p0 = pnand %p552_p13, %p551_p12 }
  0x1b   : > { %p554_p3 = pneg %p553_p0 }
  0x1d   : > { %p559_p7 = pnand %p557_p5, %p554_p3 }
  0x1f   : > { %562 = shalt.err (!%p559_p7)
}
  0x20   : > { %s563_s10 = scalar_lea.vmem %s149_s26, 16  ;;  %s570_s11 = scalar_lea.vmem %s149_s26, 32 }
  0x21   : > { %p564_p10 = scmp.ne.s32.totalorder %s149_s26, %s563_s10  ;;  %p571_p1 = scmp.lt.s32.totalorder %s149_s26, %s149_s26 }
  0x22   : > { %p572_p4 = scmp.lt.s32.totalorder %s570_s11, %s563_s10 }
  0x23   : > { %p566_p9 = pnand %p564_p10, %p552_p13 }
  0x24   : > { %p573_p8 = por %p572_p4, %p571_p1 }
  0x25   : > { %p567_p6 = pneg %p566_p9 }
  0x27   : > { %p574_p2 = pnand %p573_p8, %p567_p6 }
  0x29   : > { %577 = shalt.err (!%p574_p2)
}
  0x2a   : > { %474 = dma.hbm_to_vmem [thread:$0]  (!%p815_p11), %s999_s1, 16, %s149_s26, [#allocation6]  }
  0x2b   : > { %s578_s30 = scalar_lea.hbm %s1000_s2, 256 }
  0x2c   : > { %p579_p9 = scmp.ne.s32.totalorder %s1000_s2, %s578_s30  ;;  %p585_p2 = scmp.lt.u32.totalorder %s578_s30, %s1000_s2 }
  0x2e   : > { %p581_p1 = pnand %p579_p9, %p552_p13 }
  0x30   : > { %p582_p4 = pneg %p581_p1 }
  0x32   : > { %p587_p6 = pnand %p585_p2, %p582_p4 }
  0x34   : > { %590 = shalt.err (!%p587_p6)
}
  0x35   : > { %s591_s26 = scalar_lea.vmem %s819_s28, 256  ;;  %p599_p3 = scmp.lt.s32.totalorder %s819_s28, %s819_s28 }
  0x36   : > { %p592_p8 = scmp.ne.s32.totalorder %s819_s28, %s591_s26  ;;  %p600_p5 = scmp.lt.s32.totalorder %s591_s26, %s591_s26 }
  0x38   : > { %p594_p12 = pnand %p592_p8, %p552_p13  ;;  %p601_p7 = por %p600_p5, %p599_p3 }
  0x3a   : > { %p595_p0 = pneg %p594_p12 }
  0x3c   : > { %p602_p10 = pnand %p601_p7, %p595_p0 }
  0x3e   : > { %605 = shalt.err (!%p602_p10)
}
  0x3f   : > { %s726_s8 = smov 64   ;;  %s727_s9 = smov 4  }
  0x40   : > { %477 = dma.hbm_to_vmem [thread:$0]  (!%p815_p11), %s1000_s2, 256, %s819_s28, [#allocation6], %s726_s8, %s726_s8, %s727_s9  }
  0x41   : > { %s32_s18 = sadd.s32 1, %s718_s16  ;;  %s41_s19 = sadd.s32 1, %s710_s14 }
  0x42   : > { %p34_p13 = scmp.ge.s32.totalorder %s32_s18, 2  ;;  %p48_p9 = scmp.ne.s32.totalorder %s710_s14, %s706_s13 }
  0x43   : > { %p49_p1 = scmp.eq.s32.totalorder %s722_s17, 0  ;;  %p488_p4 = scmp.lt.s32.totalorder %s722_s17, 2 }
  0x44   : > { %s1026_s18 = smov (%p34_p13, %s32_s18), 0  ;;  %p1012_p6 = scmp.ne.s32.totalorder %s1007_s21, 0 }
  0x45   : > { %p50_p2 = por %p49_p1, %p48_p9  ;;  %s36_s29 = ssub.s32 %s718_s16, %s1026_s18 }
  0x46   : > { %p878_p8 = por %p1012_p6, %p48_p9  ;;  %s172_s27 = sand.u32 1, %s710_s14  }
  0x47   : > { %p39_p12 = scmp.eq.s32.totalorder %s36_s29, 0  ;;  %s433_s28 = sshll.u32 %s172_s27, 3 }
  0x48   : > { %s434_s30 = sshll.u32 %s718_s16, 7  ;;  %s176_s21 = scalar_lea.vmem [#allocation2], %s433_s28 }
  0x49   : > { %s887_s4 = scalar_select %p39_p12, %s710_s14, %s41_s19  }
  0x4a   : > { %s892_s7 = scalar_lea.hbm %s998_s0, %s434_s30  ;;  %s184_s26 = sshll.u32 %s176_s21, 4  ;;  %s900_s26 = int_to_ptr.vmem [resolvable:$true] %s184_s26 }
  0x4b   : > { %p896_p11 = pnand %p488_p4, %p50_p2  ;;  %s173_s9 = scalar_lea.sflag [#allocation3], %s172_s27 }
  0x4c   : > { %s606_s10 = scalar_lea.hbm %s892_s7, 128  ;;  %s611_s29 = scalar_lea.hbm %s998_s0, 256 }
  0x4d   : > { %p607_p0 = scmp.ne.s32.totalorder %s892_s7, %s606_s10  ;;  %p608_p3 = pneg %p896_p11 }
  0x4e   : > { %p612_p10 = scmp.lt.u32.totalorder %s892_s7, %s998_s0  ;;  %p613_p13 = scmp.lt.u32.totalorder %s611_s29, %s606_s10 }
  0x4f   : > { %p609_p5 = pnand %p608_p3, %p607_p0  ;;  %p615_p1 = scmp.lt.u32.totalorder %s606_s10, %s892_s7 }
  0x50   : > { %p614_p9 = por %p613_p13, %p612_p10 }
  0x51   : > { %p610_p7 = pneg %p609_p5 }
  0x52   : > { %p616_p4 = por %p615_p1, %p614_p9 }
  0x54   : > { %p617_p2 = pnand %p616_p4, %p610_p7 }
  0x56   : > { %620 = shalt.err (!%p617_p2)
}
  0x57   : > { %s621_s27 = scalar_lea.vmem %s900_s26, 128  ;;  %s728_s5 = smov [#allocation2]  }
  0x58   : > { %p622_p6 = scmp.ne.s32.totalorder %s900_s26, %s621_s27  ;;  %s626_s6 = sshll.u32 %s728_s5, 4  ;;  %s627_s6 = int_to_ptr.vmem [resolvable:$false] %s626_s6 }
  0x59   : > { %s628_s21 = scalar_lea.vmem %s627_s6, 256  ;;  %p629_p5 = scmp.lt.s32.totalorder %s900_s26, %s627_s6 }
  0x5a   : > { %p624_p12 = pnand %p622_p6, %p608_p3  ;;  %p630_p10 = scmp.lt.s32.totalorder %s628_s21, %s621_s27 }
  0x5c   : > { %p625_p0 = pneg %p624_p12  ;;  %p631_p13 = por %p630_p10, %p629_p5 }
  0x5e   : > { %p632_p9 = pnand %p631_p13, %p625_p0 }
  0x60   : > { %635 = shalt.err (!%p632_p9)
}
  0x61   : > { %481 = dma.hbm_to_vmem [thread:$0]  (!%p896_p11), %s892_s7, 128, %s900_s26, %s173_s9  }
  0x62   : > { %p1015_p7 = scmp.ne.s32.totalorder %s1010_s24, 0 }
  0x63   : > { %s930_s10 = sand.u32 (!%p1015_p7), 1, %s706_s13   ;;  %p1016_p3 = scmp.ne.s32.totalorder (!%p1015_p7), %s1008_s22, 0 }
  0x64   : > { %193 = sbr.rel (%p1015_p7) target bundleno = 506 (0x1fa), region = 32  ;;  %s436_s11 = sshll.u32 (!%p1015_p7), %s930_s10, 3 }
  0x65   : > { %s196_s19 = scalar_lea.sflag (!%p1015_p7), [#allocation3], %s930_s10  ;;  %s199_s29 = scalar_lea.vmem (!%p1015_p7), [#allocation2], %s436_s11 }
  0x6b   : > { %689 = dma.done.wait (%p1016_p3), %s196_s19, 128  }
  0x6c   : > { %691 = vsyncadd (%p1016_p3), %s196_s19, 4294967168  ;;  %p1017_p1 = scmp.ne.s32.totalorder %s1006_s20, 0 }
  0x6e   : > { %693 = dma.done.wait (%p1017_p1), [#allocation6], 272  }
  0x6f   : > { %695 = vsyncadd (%p1017_p1), [#allocation6], 4294967024  ;;  %v231_v0 = vld [vmem:[%s199_s29] sm:$0xff]  ;;  %vm234_vm0 = vcmask 261120   ;;  %v546_v3 = vld [vmem:[#allocation7] sm:$0xff]   ;;  %v729_v4 = vmov 0.0  }
  0x70   : > { %v233_v1 = vmul.f32 %v231_v0, %v231_v0  ;;  %451 = vmatprep.subr.bf16.mxu0 %v729_v4  ;;  %vm730_vm1 = vmmov 0   ;;  %v547_v5 = vld [vmem:[#allocation7 + $0x8] sm:$0xff]   ;;  %v440_v10 = vld [vmem:[#allocation5] ss:$0 sm:$0xff]  ;;  %s439_s20 = sshll.u32 %s930_s10, 2  ;;  %s445_s22 = sshll.u32 %s714_s15, 6 }
  0x71   : > { %455 = vmatprep.mubr.msk.bf16.mxu0 %vm730_vm1, %v729_v4  ;;  %452 = vmatpush3.bf16.msra.mxu0 %v546_v3  ;;  %s229_s24 = scalar_lea.vmem [#allocation8], %s439_s20  ;;  %vm311_vm2 = vcmask 781312   ;;  %s949_s9 = scalar_lea.hbm %s1001_s3, %s445_s22 }
  0x72   : > { %v235_v2 = vsel %vm234_vm0, %v233_v1, 0.0  ;;  %453 = vmatprep.subr.bf16.mxu0 %v729_v4  ;;  %s328_s7 = sshll.u32 %s229_s24, 4  ;;  %s314_s15 = scalar_lea.sflag [#allocation4], %s930_s10  ;;  %s951_s7 = int_to_ptr.vmem [resolvable:$true] %s328_s7 }
  0x73   : > { %236 = vadd.xlane.f32.xlu0 %v235_v2  ;;  %s636_s28 = scalar_lea.vmem %s951_s7, 64  ;;  %s731_s30 = smov [#allocation8]  }
  0x74   : > { %p637_p11 = scmp.ne.s32.totalorder %s951_s7, %s636_s28  ;;  %s640_s27 = sshll.u32 %s731_s30, 4  ;;  %s641_s27 = int_to_ptr.vmem [resolvable:$false] %s640_s27 }
  0x75   : > { %454 = vmatpush3.bf16.msra.mxu0 %v547_v5  ;;  %s642_s5 = scalar_lea.vmem %s641_s27, 128  ;;  %p643_p6 = scmp.lt.s32.totalorder %s951_s7, %s641_s27 }
  0x76   : > { %p638_p4 = pnand %p637_p11, %p878_p8  ;;  %p644_p12 = scmp.lt.s32.totalorder %s642_s5, %s636_s28 }
  0x78   : > { %p639_p2 = pneg %p638_p4  ;;  %p645_p0 = por %p644_p12, %p643_p6 }
  0x7a   : > { %p646_p5 = pnand %p645_p0, %p639_p2 }
 0x100   : > { %v237_v6 = vpop.xlane.xlu0 %236 }
 0x101   : > { %v239_v7 = vmul.f32 0.03125, %v237_v6 }
 0x103   : > { %v240_v8 = vadd.f32 1e-06, %v239_v7 }
 0x105   : > { %548 = vrsqrt.f32 %v240_v8 }
 0x10f   : > { %v549_v9 = vpop.eup %548 }
 0x110   : > { %v242_v11 = vmul.f32 %v549_v9, %v231_v0 }
 0x112   : > { %v249_v12 = vmul.f32 %v440_v10, %v242_v11 }
 0x114   : > { %v250_v13 = vpack.c.bf16 %v249_v12, %v249_v12 }
 0x116   : > { %456 = vmatmul.mubr.msk.bf16.vlgmr.msra.gmra.mrb[0].mxu0 %vm234_vm0, %v250_v13 }
 0x1e9   : > { %v304_v14 = vpop.f32.mrb[0].mxu0 }
 0x1ea   : > { %v310_v15 = vpack.c.bf16 %v304_v14, %v304_v14  ;;  %v457_v16 = vpop.f32.mrb[1].mxu0 }
 0x1eb   : > { %v307_v17 = vpop.f32.mrb[2].mxu0 }
 0x1ec   : > { %v458_v18 = vpop.f32.mrb[3].mxu0  ;;  %312 = vst.msk [vmem:[%s229_s24] sm:$0xf] %vm311_vm2, %v310_v15 }
 0x1ed   : > { %649 = shalt.err (!%p646_p5)
}
 0x1ee   : > { %s650_s6 = scalar_lea.hbm %s949_s9, 64  ;;  %s654_s11 = scalar_lea.hbm %s1001_s3, 128 }
 0x1ef   : > { %p651_p10 = scmp.ne.s32.totalorder %s949_s9, %s650_s6  ;;  %p655_p7 = scmp.lt.u32.totalorder %s949_s9, %s1001_s3 }
 0x1f0   : > { %p656_p3 = scmp.lt.u32.totalorder %s654_s11, %s650_s6  ;;  %p658_p11 = scmp.lt.u32.totalorder %s650_s6, %s949_s9 }
 0x1f1   : > { %p652_p13 = pnand %p651_p10, %p878_p8 }
 0x1f2   : > { %p657_p1 = por %p656_p3, %p655_p7 }
 0x1f3   : > { %p653_p9 = pneg %p652_p13 }
 0x1f4   : > { %p659_p4 = por %p658_p11, %p657_p1 }
 0x1f6   : > { %p660_p2 = pnand %p659_p4, %p653_p9 }
 0x1f8   : > { %663 = shalt.err (!%p660_p2)
}
 0x1f9   : > { %469 = dma.vmem_to_hbm [thread:$0]  (%p878_p8), %s951_s7, 64, %s949_s9, %s314_s15  }
 0x1fa PF: > { %s340_s20 = sand.u32 1, %s702_s12   ;;  %p1018_p6 = scmp.ne.s32.totalorder %s1009_s23, 0 }
 0x1fb   : > { %p1019_p12 = scmp.ge.s32.totalorder %s722_s17, 2  ;;  %s341_s22 = scalar_lea.sflag [#allocation4], %s340_s20 }
 0x1fd   : > { %p483_p0 = pnand %p1019_p12, %p1018_p6 }
 0x1ff   : > { %697 = dma.done.wait (!%p483_p0), %s341_s22, 64  }
 0x200   : > { %699 = vsyncadd (!%p483_p0), %s341_s22, 4294967232  ;;  %s20_s17 = sadd.s32 1, %s722_s17   ;;  %s1020_s12 = smov %s706_s13 }
 0x201   : > { %p17_p5 = scmp.ge.s32.totalorder %s20_s17, 4   ;;  %s1021_s13 = smov %s710_s14 }
 0x202   : > { %s1022_s14 = smov %s887_s4  ;;  %s1023_s15 = smov %s718_s16 }
 0x203   : > { %s1024_s16 = smov %s1026_s18  ;;  %19 = sbr.rel (!%p17_p5) target bundleno = 7 (0x7), region = 85 }
 0x20a   :  { %346 = vsyncpa [#allocation3], 1 }
 0x20b   :  { %348 = vsyncpa [#allocation3 + $0x1], 1 }
 0x20c   :  { %349 = vsyncpa [#allocation6], 1 }
 0x20d   :  { %350 = vsyncpa [#allocation4], 1 }
 0x20e   :  { %352 = vsyncpa [#allocation4 + $0x1], 1 }

// kernel: tpu_custom_call.1
= control target key start
LH: loop header
LB: loop body
LE: loop exit
PB: predicated region body
PF: predicated region fallthrough
CT: control target
= control target key end

     0   :  { %8 = vsyncpa [#allocation3], 0  ;;  %s998_s0 = inlined_call_operand.hbm [shape: f32[2,8,32], index: 0, kind: input, shape index: {}]   ;;  %s999_s1 = inlined_call_operand.hbm [shape: f32[1,32], index: 1, kind: input, shape index: {}]   ;;  %s1000_s2 = inlined_call_operand.hbm [shape: bf16[32,96], index: 2, kind: input, shape index: {}]   ;;  %s1001_s3 = inlined_call_operand.hbm [shape: bf16[2,8,96], index: 3, kind: output, shape index: {}]  }
   0x1   :  { %10 = vsyncpa [#allocation3 + $0x1], 0 }
   0x2   :  { %11 = vsyncpa [#allocation6], 0 }
   0x3   :  { %12 = vsyncpa [#allocation4], 0 }
   0x4   :  { %14 = vsyncpa [#allocation4 + $0x1], 0  ;;  %s752_s12 = smov 0   ;;  %s754_s13 = smov 0  }
   0x5   :  { %s756_s14 = smov 0   ;;  %s758_s15 = smov 0  }
   0x6   :  { %s760_s16 = smov 0   ;;  %s762_s17 = smov 0  }
   0x7 LB: > { %s427_s18 = sadd.s32 4294967295, %s722_s17   ;;  %s428_s19 = sadd.s32 4294967294, %s722_s17   ;;  %s722_s17 = sphi %s762_s17, %s20_s17   ;;  %s718_s16 = sphi %s760_s16, %s1024_s16   ;;  %s714_s15 = sphi %s758_s15, %s1023_s15   ;;  %s710_s14 = sphi %s756_s14, %s1022_s14   ;;  %s706_s13 = sphi %s754_s13, %s1021_s13   ;;  %s702_s12 = sphi %s752_s12, %s1020_s12  }
   0x8   : > { %p54_p0 = scmp.ne.s32.totalorder %s706_s13, %s702_s12  ;;  %p786_p1 = scmp.eq.s32.totalorder %s427_s18, 0 }
   0x9   : > { %p790_p2 = scmp.eq.s32.totalorder %s427_s18, 1  ;;  %p128_p3 = scmp.eq.s32.totalorder %s428_s19, 1 }
   0xa   : > { %s1006_s20 = scalar_select %p786_p1, 1, 0 }
   0xb   : > { %s1007_s21 = scalar_select %p790_p2, 1, 0 }
   0xc   : > { %p796_p4 = por %p786_p1, %p54_p0  ;;  %p429_p5 = scmp.ge.s32.totalorder %s722_s17, 1 }
   0xd   : > { %p801_p6 = por %p128_p3, %p54_p0  ;;  %p135_p7 = scmp.lt.s32.totalorder %s722_s17, 3 }
   0xe   : > { %s1008_s22 = scalar_select %p796_p4, 1, 0 }
   0xf   : > { %s1009_s23 = scalar_select %p801_p6, 1, 0 }
  0x10   : > { %p806_p8 = pnand %p429_p5, %p135_p7  ;;  %s724_s25 = smov [#allocation5]  }
  0x11   : > { %s148_s26 = sshll.u32 %s724_s25, 4  ;;  %s725_s27 = smov [#allocation7]   ;;  %s149_s26 = int_to_ptr.vmem [resolvable:$true] %s148_s26 }
  0x12   : > { %s1010_s24 = scalar_select %p806_p8, 1, 0 }
  0x13   : > { %p471_p10 = pneg %p806_p8  ;;  %s158_s28 = sshll.u32 %s725_s27, 4  ;;  %s819_s28 = int_to_ptr.vmem [resolvable:$true] %s158_s28 }
  0x14   : > { %s550_s5 = scalar_lea.hbm %s999_s1, 16 }
  0x15   : > { %p815_p11 = pnand %p471_p10, %p786_p1  ;;  %p551_p12 = scmp.ne.s32.totalorder %s999_s1, %s550_s5 }
  0x16   : > { %p557_p5 = scmp.lt.u32.totalorder %s550_s5, %s999_s1 }
  0x17   : > { %p552_p13 = pneg %p815_p11 }
  0x19   : > { %p553_p0 = pnand %p552_p13, %p551_p12 }
  0x1b   : > { %p554_p3 = pneg %p553_p0 }
  0x1d   : > { %p559_p7 = pnand %p557_p5, %p554_p3 }
  0x1f   : > { %562 = shalt.err (!%p559_p7)
}
  0x20   : > { %s563_s10 = scalar_lea.vmem %s149_s26, 16  ;;  %s570_s11 = scalar_lea.vmem %s149_s26, 32 }
  0x21   : > { %p564_p10 = scmp.ne.s32.totalorder %s149_s26, %s563_s10  ;;  %p571_p1 = scmp.lt.s32.totalorder %s149_s26, %s149_s26 }
  0x22   : > { %p572_p4 = scmp.lt.s32.totalorder %s570_s11, %s563_s10 }
  0x23   : > { %p566_p9 = pnand %p564_p10, %p552_p13 }
  0x24   : > { %p573_p8 = por %p572_p4, %p571_p1 }
  0x25   : > { %p567_p6 = pneg %p566_p9 }
  0x27   : > { %p574_p2 = pnand %p573_p8, %p567_p6 }
  0x29   : > { %577 = shalt.err (!%p574_p2)
}
  0x2a   : > { %474 = dma.hbm_to_vmem [thread:$0]  (!%p815_p11), %s999_s1, 16, %s149_s26, [#allocation6]  }
  0x2b   : > { %s578_s30 = scalar_lea.hbm %s1000_s2, 256 }
  0x2c   : > { %p579_p9 = scmp.ne.s32.totalorder %s1000_s2, %s578_s30  ;;  %p585_p2 = scmp.lt.u32.totalorder %s578_s30, %s1000_s2 }
  0x2e   : > { %p581_p1 = pnand %p579_p9, %p552_p13 }
  0x30   : > { %p582_p4 = pneg %p581_p1 }
  0x32   : > { %p587_p6 = pnand %p585_p2, %p582_p4 }
  0x34   : > { %590 = shalt.err (!%p587_p6)
}
  0x35   : > { %s591_s26 = scalar_lea.vmem %s819_s28, 256  ;;  %p599_p3 = scmp.lt.s32.totalorder %s819_s28, %s819_s28 }
  0x36   : > { %p592_p8 = scmp.ne.s32.totalorder %s819_s28, %s591_s26  ;;  %p600_p5 = scmp.lt.s32.totalorder %s591_s26, %s591_s26 }
  0x38   : > { %p594_p12 = pnand %p592_p8, %p552_p13  ;;  %p601_p7 = por %p600_p5, %p599_p3 }
  0x3a   : > { %p595_p0 = pneg %p594_p12 }
  0x3c   : > { %p602_p10 = pnand %p601_p7, %p595_p0 }
  0x3e   : > { %605 = shalt.err (!%p602_p10)
}
  0x3f   : > { %s726_s8 = smov 64   ;;  %s727_s9 = smov 4  }
  0x40   : > { %477 = dma.hbm_to_vmem [thread:$0]  (!%p815_p11), %s1000_s2, 256, %s819_s28, [#allocation6], %s726_s8, %s726_s8, %s727_s9  }
  0x41   : > { %s32_s18 = sadd.s32 1, %s718_s16  ;;  %s41_s19 = sadd.s32 1, %s710_s14 }
  0x42   : > { %p34_p13 = scmp.ge.s32.totalorder %s32_s18, 2  ;;  %p48_p9 = scmp.ne.s32.totalorder %s710_s14, %s706_s13 }
  0x43   : > { %p49_p1 = scmp.eq.s32.totalorder %s722_s17, 0  ;;  %p488_p4 = scmp.lt.s32.totalorder %s722_s17, 2 }
  0x44   : > { %s1026_s18 = smov (%p34_p13, %s32_s18), 0  ;;  %p1012_p6 = scmp.ne.s32.totalorder %s1007_s21, 0 }
  0x45   : > { %p50_p2 = por %p49_p1, %p48_p9  ;;  %s36_s29 = ssub.s32 %s718_s16, %s1026_s18 }
  0x46   : > { %p878_p8 = por %p1012_p6, %p48_p9  ;;  %s172_s27 = sand.u32 1, %s710_s14  }
  0x47   : > { %p39_p12 = scmp.eq.s32.totalorder %s36_s29, 0  ;;  %s433_s28 = sshll.u32 %s172_s27, 3 }
  0x48   : > { %s434_s30 = sshll.u32 %s718_s16, 7  ;;  %s176_s21 = scalar_lea.vmem [#allocation2], %s433_s28 }
  0x49   : > { %s887_s4 = scalar_select %p39_p12, %s710_s14, %s41_s19  }
  0x4a   : > { %s892_s7 = scalar_lea.hbm %s998_s0, %s434_s30  ;;  %s184_s26 = sshll.u32 %s176_s21, 4  ;;  %s900_s26 = int_to_ptr.vmem [resolvable:$true] %s184_s26 }
  0x4b   : > { %p896_p11 = pnand %p488_p4, %p50_p2  ;;  %s173_s9 = scalar_lea.sflag [#allocation3], %s172_s27 }
  0x4c   : > { %s606_s10 = scalar_lea.hbm %s892_s7, 128  ;;  %s611_s29 = scalar_lea.hbm %s998_s0, 256 }
  0x4d   : > { %p607_p0 = scmp.ne.s32.totalorder %s892_s7, %s606_s10  ;;  %p608_p3 = pneg %p896_p11 }
  0x4e   : > { %p612_p10 = scmp.lt.u32.totalorder %s892_s7, %s998_s0  ;;  %p613_p13 = scmp.lt.u32.totalorder %s611_s29, %s606_s10 }
  0x4f   : > { %p609_p5 = pnand %p608_p3, %p607_p0  ;;  %p615_p1 = scmp.lt.u32.totalorder %s606_s10, %s892_s7 }
  0x50   : > { %p614_p9 = por %p613_p13, %p612_p10 }
  0x51   : > { %p610_p7 = pneg %p609_p5 }
  0x52   : > { %p616_p4 = por %p615_p1, %p614_p9 }
  0x54   : > { %p617_p2 = pnand %p616_p4, %p610_p7 }
  0x56   : > { %620 = shalt.err (!%p617_p2)
}
  0x57   : > { %s621_s27 = scalar_lea.vmem %s900_s26, 128  ;;  %s728_s5 = smov [#allocation2]  }
  0x58   : > { %p622_p6 = scmp.ne.s32.totalorder %s900_s26, %s621_s27  ;;  %s626_s6 = sshll.u32 %s728_s5, 4  ;;  %s627_s6 = int_to_ptr.vmem [resolvable:$false] %s626_s6 }
  0x59   : > { %s628_s21 = scalar_lea.vmem %s627_s6, 256  ;;  %p629_p5 = scmp.lt.s32.totalorder %s900_s26, %s627_s6 }
  0x5a   : > { %p624_p12 = pnand %p622_p6, %p608_p3  ;;  %p630_p10 = scmp.lt.s32.totalorder %s628_s21, %s621_s27 }
  0x5c   : > { %p625_p0 = pneg %p624_p12  ;;  %p631_p13 = por %p630_p10, %p629_p5 }
  0x5e   : > { %p632_p9 = pnand %p631_p13, %p625_p0 }
  0x60   : > { %635 = shalt.err (!%p632_p9)
}
  0x61   : > { %481 = dma.hbm_to_vmem [thread:$0]  (!%p896_p11), %s892_s7, 128, %s900_s26, %s173_s9  }
  0x62   : > { %p1015_p7 = scmp.ne.s32.totalorder %s1010_s24, 0 }
  0x63   : > { %s930_s10 = sand.u32 (!%p1015_p7), 1, %s706_s13   ;;  %p1016_p3 = scmp.ne.s32.totalorder (!%p1015_p7), %s1008_s22, 0 }
  0x64   : > { %193 = sbr.rel (%p1015_p7) target bundleno = 506 (0x1fa), region = 32  ;;  %s436_s11 = sshll.u32 (!%p1015_p7), %s930_s10, 3 }
  0x65   : > { %s196_s19 = scalar_lea.sflag (!%p1015_p7), [#allocation3], %s930_s10  ;;  %s199_s29 = scalar_lea.vmem (!%p1015_p7), [#allocation2], %s436_s11 }
  0x6b   : > { %689 = dma.done.wait (%p1016_p3), %s196_s19, 128  }
  0x6c   : > { %691 = vsyncadd (%p1016_p3), %s196_s19, 4294967168  ;;  %p1017_p1 = scmp.ne.s32.totalorder %s1006_s20, 0 }
  0x6e   : > { %693 = dma.done.wait (%p1017_p1), [#allocation6], 272  }
  0x6f   : > { %695 = vsyncadd (%p1017_p1), [#allocation6], 4294967024  ;;  %v231_v0 = vld [vmem:[%s199_s29] sm:$0xff]  ;;  %vm234_vm0 = vcmask 261120   ;;  %v546_v3 = vld [vmem:[#allocation7] sm:$0xff]   ;;  %v729_v4 = vmov 0.0  }
  0x70   : > { %v233_v1 = vmul.f32 %v231_v0, %v231_v0  ;;  %451 = vmatprep.subr.bf16.mxu0 %v729_v4  ;;  %vm730_vm1 = vmmov 0   ;;  %v547_v5 = vld [vmem:[#allocation7 + $0x8] sm:$0xff]   ;;  %v440_v10 = vld [vmem:[#allocation5] ss:$0 sm:$0xff]  ;;  %s439_s20 = sshll.u32 %s930_s10, 2  ;;  %s445_s22 = sshll.u32 %s714_s15, 6 }
  0x71   : > { %455 = vmatprep.mubr.msk.bf16.mxu0 %vm730_vm1, %v729_v4  ;;  %452 = vmatpush3.bf16.msra.mxu0 %v546_v3  ;;  %s229_s24 = scalar_lea.vmem [#allocation8], %s439_s20  ;;  %vm311_vm2 = vcmask 781312   ;;  %s949_s9 = scalar_lea.hbm %s1001_s3, %s445_s22 }
  0x72   : > { %v235_v2 = vsel %vm234_vm0, %v233_v1, 0.0  ;;  %453 = vmatprep.subr.bf16.mxu0 %v729_v4  ;;  %s328_s7 = sshll.u32 %s229_s24, 4  ;;  %s314_s15 = scalar_lea.sflag [#allocation4], %s930_s10  ;;  %s951_s7 = int_to_ptr.vmem [resolvable:$true] %s328_s7 }
  0x73   : > { %236 = vadd.xlane.f32.xlu0 %v235_v2  ;;  %s636_s28 = scalar_lea.vmem %s951_s7, 64  ;;  %s731_s30 = smov [#allocation8]  }
  0x74   : > { %p637_p11 = scmp.ne.s32.totalorder %s951_s7, %s636_s28  ;;  %s640_s27 = sshll.u32 %s731_s30, 4  ;;  %s641_s27 = int_to_ptr.vmem [resolvable:$false] %s640_s27 }
  0x75   : > { %454 = vmatpush3.bf16.msra.mxu0 %v547_v5  ;;  %s642_s5 = scalar_lea.vmem %s641_s27, 128  ;;  %p643_p6 = scmp.lt.s32.totalorder %s951_s7, %s641_s27 }
  0x76   : > { %p638_p4 = pnand %p637_p11, %p878_p8  ;;  %p644_p12 = scmp.lt.s32.totalorder %s642_s5, %s636_s28 }
  0x78   : > { %p639_p2 = pneg %p638_p4  ;;  %p645_p0 = por %p644_p12, %p643_p6 }
  0x7a   : > { %p646_p5 = pnand %p645_p0, %p639_p2 }
 0x100   : > { %v237_v6 = vpop.xlane.xlu0 %236 }
 0x101   : > { %v239_v7 = vmul.f32 0.03125, %v237_v6 }
 0x103   : > { %v240_v8 = vadd.f32 1e-06, %v239_v7 }
 0x105   : > { %548 = vrsqrt.f32 %v240_v8 }
 0x10f   : > { %v549_v9 = vpop.eup %548 }
 0x110   : > { %v242_v11 = vmul.f32 %v549_v9, %v231_v0 }
 0x112   : > { %v249_v12 = vmul.f32 %v440_v10, %v242_v11 }
 0x114   : > { %v250_v13 = vpack.c.bf16 %v249_v12, %v249_v12 }
 0x116   : > { %456 = vmatmul.mubr.msk.bf16.vlgmr.msra.gmra.mrb[0].mxu0 %vm234_vm0, %v250_v13 }
 0x1e9   : > { %v304_v14 = vpop.f32.mrb[0].mxu0 }
 0x1ea   : > { %v310_v15 = vpack.c.bf16 %v304_v14, %v304_v14  ;;  %v457_v16 = vpop.f32.mrb[1].mxu0 }
 0x1eb   : > { %v307_v17 = vpop.f32.mrb[2].mxu0 }
 0x1ec   : > { %v458_v18 = vpop.f32.mrb[3].mxu0  ;;  %312 = vst.msk [vmem:[%s229_s24] sm:$0xf] %vm311_vm2, %v310_v15 }
 0x1ed   : > { %649 = shalt.err (!%p646_p5)
}
 0x1ee   : > { %s650_s6 = scalar_lea.hbm %s949_s9, 64  ;;  %s654_s11 = scalar_lea.hbm %s1001_s3, 128 }
 0x1ef   : > { %p651_p10 = scmp.ne.s32.totalorder %s949_s9, %s650_s6  ;;  %p655_p7 = scmp.lt.u32.totalorder %s949_s9, %s1001_s3 }
 0x1f0   : > { %p656_p3 = scmp.lt.u32.totalorder %s654_s11, %s650_s6  ;;  %p658_p11 = scmp.lt.u32.totalorder %s650_s6, %s949_s9 }
 0x1f1   : > { %p652_p13 = pnand %p651_p10, %p878_p8 }
 0x1f2   : > { %p657_p1 = por %p656_p3, %p655_p7 }
 0x1f3   : > { %p653_p9 = pneg %p652_p13 }
 0x1f4   : > { %p659_p4 = por %p658_p11, %p657_p1 }
 0x1f6   : > { %p660_p2 = pnand %p659_p4, %p653_p9 }
 0x1f8   : > { %663 = shalt.err (!%p660_p2)
}
 0x1f9   : > { %469 = dma.vmem_to_hbm [thread:$0]  (%p878_p8), %s951_s7, 64, %s949_s9, %s314_s15  }
 0x1fa PF: > { %s340_s20 = sand.u32 1, %s702_s12   ;;  %p1018_p6 = scmp.ne.s32.totalorder %s1009_s23, 0 }
 0x1fb   : > { %p1019_p12 = scmp.ge.s32.totalorder %s722_s17, 2  ;;  %s341_s22 = scalar_lea.sflag [#allocation4], %s340_s20 }
 0x1fd   : > { %p483_p0 = pnand %p1019_p12, %p1018_p6 }
 0x1ff   : > { %697 = dma.done.wait (!%p483_p0), %s341_s22, 64  }
 0x200   : > { %699 = vsyncadd (!%p483_p0), %s341_s22, 4294967232  ;;  %s20_s17 = sadd.s32 1, %s722_s17   ;;  %s1020_s12 = smov %s706_s13 }
 0x201   : > { %p17_p5 = scmp.ge.s32.totalorder %s20_s17, 4   ;;  %s1021_s13 = smov %s710_s14 }
 0x202   : > { %s1022_s14 = smov %s887_s4  ;;  %s1023_s15 = smov %s718_s16 }
 0x203   : > { %s1024_s16 = smov %s1026_s18  ;;  %19 = sbr.rel (!%p17_p5) target bundleno = 7 (0x7), region = 85 }
 0x20a   :  { %346 = vsyncpa [#allocation3], 1 }
 0x20b   :  { %348 = vsyncpa [#allocation3 + $0x1], 1 }
 0x20c   :  { %349 = vsyncpa [#allocation6], 1 }
 0x20d   :  { %350 = vsyncpa [#allocation4], 1 }
 0x20e   :  { %352 = vsyncpa [#allocation4 + $0x1], 1 }

</bundles_post_ra>
